<compile_context>
chip_gen: v7x
topology: tpu7x:2x2x1
jax: 0.10.0
libtpu: 0.0.40
codegen_flags: <defaults>
</compile_context>

<pallas_src>
import functools

import jax
import jax.numpy as jnp
from jax.experimental import pallas as pl
from jax.experimental.pallas import tpu as pltpu


def _round_up(v, m):
    return ((v + m - 1) // m) * m


def _pad2(a, rows, cols):
    return jnp.pad(a, ((0, rows - a.shape[0]), (0, cols - a.shape[1])))


def _pick_tile(n_pad, block):
    """Largest multiple of 128 that divides n_pad and does not exceed block."""
    best = 128
    cap = min(_round_up(block, 128), n_pad)
    t = 256
    while t <= cap:
        if n_pad % t == 0:
            best = t
        t += 128
    return best


def _vmem_limit_bytes():
    """Per-generation VMEM budget with headroom (v7x: 64 MiB phys -> ~48 MiB;
    v5e/v6e: 128 MiB phys -> ~96-100 MiB)."""
    cap = 128 * 1024 * 1024
    try:
        info = pltpu.get_tpu_info()
        cap = int(getattr(info, "vmem_capacity_bytes", cap))
    except Exception:
        pass
    return int(min(cap * 3 // 4, 100 * 1024 * 1024))


# ---------------------------------------------------------------------------
# Fused 2-layer kernel (adj resident in VMEM, single invocation, no grid).
# ---------------------------------------------------------------------------
def fused_gcn_kernel(adj_ref, x_ref, w1_ref, b1_ref, w2_ref, b2_ref, o_ref, *,
                     agg_first_1, agg_first_2):
    adj = adj_ref[...]

    def layer(feat_bf16, w_ref, b_ref, agg_first):
        if agg_first:
            # (adj @ x) in the narrower input width, then W in f32 (no
            # rounding of the accumulated aggregation).
            agg = jnp.dot(adj, feat_bf16, preferred_element_type=jnp.float32)
            out = jnp.dot(agg, w_ref[...].astype(jnp.float32),
                          preferred_element_type=jnp.float32)
        else:
            sup = jnp.dot(feat_bf16, w_ref[...],
                          preferred_element_type=jnp.float32)
            out = jnp.dot(adj, sup.astype(jnp.bfloat16),
                          preferred_element_type=jnp.float32)
        return out + b_ref[...]

    h = jnp.maximum(layer(x_ref[...], w1_ref, b1_ref, agg_first_1), 0.0)
    # TODO(synk): training-mode F.dropout would need pltpu.prng_seed +
    # pltpu.prng_random_bits masking; eval-mode forward is the identity.
    out = layer(h.astype(jnp.bfloat16), w2_ref, b2_ref, agg_first_2)
    o_ref[...] = out.astype(o_ref.dtype)


def fused_gcn(adj_p, x_p, w1_p, b1_p, w2_p, b2_p, *, vmem_limit):
    n_pad = adj_p.shape[0]
    f_in_p, f_hid_p = w1_p.shape
    f_out_p = w2_p.shape[1]
    agg1 = f_in_p <= f_hid_p
    agg2 = f_hid_p <= f_out_p

    flops = (2 * n_pad * n_pad * (f_in_p if agg1 else f_hid_p)
             + 2 * n_pad * f_in_p * f_hid_p
             + 2 * n_pad * n_pad * (f_hid_p if agg2 else f_out_p)
             + 2 * n_pad * f_hid_p * f_out_p)
    bytes_accessed = (adj_p.size * 2 + x_p.size * 2 + w1_p.size * 2
                      + w2_p.size * 2 + b1_p.size * 4 + b2_p.size * 4
                      + n_pad * f_out_p * 4)

    kernel = functools.partial(fused_gcn_kernel,
                               agg_first_1=agg1, agg_first_2=agg2)
    return pl.pallas_call(
        kernel,
        out_shape=jax.ShapeDtypeStruct((n_pad, f_out_p), jnp.float32),
        compiler_params=pltpu.CompilerParams(vmem_limit_bytes=vmem_limit),
        cost_estimate=pl.CostEstimate(flops=flops, transcendentals=0,
                                      bytes_accessed=bytes_accessed),
    )(adj_p, x_p, w1_p, b1_p, w2_p, b2_p)


def _fused_fits(n_pad, f_in_p, f_hid_p, f_out_p, vmem_limit):
    # Rough VMEM footprint of the fused kernel (inputs + out + f32
    # intermediates), with 2x headroom for compiler temporaries.
    est = (2 * n_pad * n_pad
           + 2 * n_pad * f_in_p
           + 6 * n_pad * f_hid_p
           + 8 * n_pad * f_out_p
           + 2 * (f_in_p * f_hid_p + f_hid_p * f_out_p)
           + 4 * (f_hid_p + f_out_p))
    return est * 2 <= vmem_limit


# ---------------------------------------------------------------------------
# Tiled single-layer kernel (large graphs): adj streamed, feature resident.
# ---------------------------------------------------------------------------
def gconv_kernel(adj_ref, feat_ref, w_ref, b_ref, o_ref, acc_ref, *,
                 tk, apply_relu, epilogue_matmul):
    """out_rowtile = [relu]( (adj_rowtile @ feat) [@ W] + b )

    grid = (row tiles of adj/out, K tiles of the adj contraction).
    feat_ref is the FULL (resident) feature matrix; the K chunk is sliced
    inside the kernel so it is DMA'd from HBM only once per layer.
    """
    k = pl.program_id(1)

    @pl.when(k == 0)
    def _init():
        acc_ref[...] = jnp.zeros_like(acc_ref)

    start = pl.multiple_of(k * tk, tk)
    acc_ref[...] += jnp.dot(adj_ref[...], feat_ref[pl.ds(start, tk), :],
                            preferred_element_type=jnp.float32)

    @pl.when(k == pl.num_programs(1) - 1)
    def _finalize():
        acc = acc_ref[...]
        if epilogue_matmul:
            # f32 epilogue matmul: avoids rounding the accumulated adj@x.
            acc = jnp.dot(acc, w_ref[...].astype(jnp.float32),
                          preferred_element_type=jnp.float32)
        acc = acc + b_ref[...]
        if apply_relu:
            acc = jnp.maximum(acc, 0.0)
        o_ref[...] = acc.astype(o_ref.dtype)


def graph_conv_layer(adj_p, feat_p, w_p, b_p, *, apply_relu, out_dtype,
                     tm, tk, vmem_limit):
    """adj_p: (Np, Np) bf16, feat_p: (Np, Fi_p) bf16, w_p: (Fi_p, Fo_p) bf16,
    b_p: (1, Fo_p) f32.  Returns a lane-padded (Np, Fo_p) array in out_dtype."""
    n_pad = adj_p.shape[0]
    f_in_p, f_out_p = w_p.shape

    # Run the dominant N x N aggregation over the narrower PADDED width
    # (ties -> aggregate-first so W is applied once per row tile in epilogue).
    aggregate_first = f_in_p <= f_out_p
    if aggregate_first:
        feat = feat_p
        width = f_in_p
    else:
        # Precompute the tiny dense transform ONCE; kernel is pure adj @ xw.
        feat = jnp.dot(feat_p.astype(jnp.float32), w_p.astype(jnp.float32),
                       preferred_element_type=jnp.float32).astype(jnp.bfloat16)
        width = f_out_p

    grid_m, grid_k = n_pad // tm, n_pad // tk

    flops = 2 * n_pad * n_pad * width
    if aggregate_first:
        flops += 2 * n_pad * f_in_p * f_out_p
    bytes_accessed = (adj_p.size * 2 + n_pad * width * 2 + w_p.size * 2
                      + b_p.size * 4
                      + n_pad * f_out_p * jnp.dtype(out_dtype).itemsize)

    kernel = functools.partial(gconv_kernel, tk=tk, apply_relu=apply_relu,
                               epilogue_matmul=aggregate_first)

    return pl.pallas_call(
        kernel,
        out_shape=jax.ShapeDtypeStruct((n_pad, f_out_p), out_dtype),
        grid_spec=pltpu.PrefetchScalarGridSpec(
            num_scalar_prefetch=0,
            grid=(grid_m, grid_k),
            in_specs=[
                pl.BlockSpec((tm, tk), lambda i, k: (i, k)),           # adj tile
                pl.BlockSpec((n_pad, width), lambda i, k: (0, 0)),     # feat resident
                pl.BlockSpec((f_in_p, f_out_p), lambda i, k: (0, 0)),  # W resident
                pl.BlockSpec((1, f_out_p), lambda i, k: (0, 0)),       # bias resident
            ],
            out_specs=pl.BlockSpec((tm, f_out_p), lambda i, k: (i, 0)),
            scratch_shapes=[pltpu.VMEM((tm, width), jnp.float32)],
        ),
        compiler_params=pltpu.CompilerParams(
            # TODO(synk): on v7x verify axis 0 is actually sharded across the
            # 2 TensorCores; if not, switch it to pltpu.CORE_PARALLEL.
            dimension_semantics=("parallel", "arbitrary"),
            vmem_limit_bytes=vmem_limit,
        ),
        cost_estimate=pl.CostEstimate(flops=flops, transcendentals=0,
                                      bytes_accessed=bytes_accessed),
    )(adj_p, feat, w_p, b_p)


# ---------------------------------------------------------------------------
# Full forward pass (eval mode): relu(gc1) -> dropout(identity) -> gc2.
# ---------------------------------------------------------------------------
def gcn_forward(x, adj, w1, b1, w2, b2, *, block=512, force_tiled=False):
    n, f_in = x.shape
    f_hid = w1.shape[1]
    f_out = w2.shape[1]

    # Shape-adaptive padding: lane width (128) only; tiles clamped to n_pad.
    n_pad = _round_up(n, 128)
    f_in_p = _round_up(f_in, 128)
    f_hid_p = _round_up(f_hid, 128)
    f_out_p = _round_up(f_out, 128)
    tile = _pick_tile(n_pad, block)

    # bf16 MXU operands (f32 accumulation inside the kernels); biases stay f32.
    adj_p = _pad2(adj, n_pad, n_pad).astype(jnp.bfloat16)
    x_p = _pad2(x, n_pad, f_in_p).astype(jnp.bfloat16)
    w1_p = _pad2(w1, f_in_p, f_hid_p).astype(jnp.bfloat16)
    b1_p = _pad2(b1.reshape(1, -1), 1, f_hid_p).astype(jnp.float32)
    w2_p = _pad2(w2, f_hid_p, f_out_p).astype(jnp.bfloat16)
    b2_p = _pad2(b2.reshape(1, -1), 1, f_out_p).astype(jnp.float32)

    vmem_limit = _vmem_limit_bytes()

    if (not force_tiled
            and _fused_fits(n_pad, f_in_p, f_hid_p, f_out_p, vmem_limit)):
        # Both layers in one call: adj loaded once, h never leaves VMEM.
        out_p = fused_gcn(adj_p, x_p, w1_p, b1_p, w2_p, b2_p,
                          vmem_limit=vmem_limit)
    else:
        h = graph_conv_layer(adj_p, x_p, w1_p, b1_p, apply_relu=True,
                             out_dtype=jnp.bfloat16, tm=tile, tk=tile,
                             vmem_limit=vmem_limit)
        out_p = graph_conv_layer(adj_p, h, w2_p, b2_p, apply_relu=False,
                                 out_dtype=jnp.float32, tm=tile, tk=tile,
                                 vmem_limit=vmem_limit)
    return out_p[:n, :f_out]


def gcn_reference(x, adj, w1, b1, w2, b2):
    h = jnp.maximum(adj @ (x @ w1) + b1, 0.0)
    return adj @ (h @ w2) + b2


if __name__ == "__main__":
    # Small shapes consistent with the module: N nodes, nfeat -> nhid -> out.
    N, NFEAT, NHID, NOUT = 8, 16, 32, 8

    key = jax.random.PRNGKey(0)
    k_x, k_a, k_w1, k_b1, k_w2, k_b2 = jax.random.split(key, 6)

    x = jax.random.normal(k_x, (N, NFEAT), dtype=jnp.float32)

    # Symmetric, row-normalized adjacency (typical GCN preprocessing).
    a = jax.random.uniform(k_a, (N, N), dtype=jnp.float32)
    a = (a + a.T) * 0.5 + jnp.eye(N, dtype=jnp.float32)
    adj = a / jnp.sum(a, axis=1, keepdims=True)

    # Parameter init mirroring GraphConvolution.reset_parameters:
    # uniform(-stdv, stdv) with stdv = 1/sqrt(out_features).
    stdv1 = 1.0 / jnp.sqrt(jnp.float32(NHID))
    stdv2 = 1.0 / jnp.sqrt(jnp.float32(NOUT))
    w1 = jax.random.uniform(k_w1, (NFEAT, NHID), jnp.float32, -stdv1, stdv1)
    b1 = jax.random.uniform(k_b1, (1, NHID), jnp.float32, -stdv1, stdv1)
    w2 = jax.random.uniform(k_w2, (NHID, NOUT), jnp.float32, -stdv2, stdv2)
    b2 = jax.random.uniform(k_b2, (1, NOUT), jnp.float32, -stdv2, stdv2)

    ref = gcn_reference(x, adj, w1, b1, w2, b2)

    # Fused (adj-resident) path — the one small/medium graphs take.
    out_fused = jax.block_until_ready(gcn_forward(x, adj, w1, b1, w2, b2))
    # Tiled per-layer path — exercised explicitly so both paths are verified.
    out_tiled = jax.block_until_ready(
        gcn_forward(x, adj, w1, b1, w2, b2, force_tiled=True))

    assert out_fused.shape == (N, NOUT), out_fused.shape
    assert out_tiled.shape == (N, NOUT), out_tiled.shape
    for name, out in (("fused", out_fused), ("tiled", out_tiled)):
        max_err = float(jnp.max(jnp.abs(out - ref)))
        # bf16 MXU inputs with f32 accumulation -> looser tolerance than f32.
        assert jnp.allclose(out, ref, atol=2e-2, rtol=2e-2), (
            f"{name} path mismatch vs reference; max abs err = {max_err}")

    print("KERNEL_OK")
</pallas_src>

<mosaic_0001>
module attributes {stable_mosaic.version = 11 : i64} {
  func.func @fused_gcn_kernel(%arg0: memref<128x128xbf16, #tpu.memory_space<vmem>>, %arg1: memref<128x128xbf16, #tpu.memory_space<vmem>>, %arg2: memref<128x128xbf16, #tpu.memory_space<vmem>>, %arg3: memref<1x128xf32, #tpu.memory_space<vmem>>, %arg4: memref<128x128xbf16, #tpu.memory_space<vmem>>, %arg5: memref<1x128xf32, #tpu.memory_space<vmem>>, %arg6: memref<128x128xf32, #tpu.memory_space<vmem>>) attributes {dimension_semantics = [], scalar_prefetch = 0 : i64, scratch_operands = 0 : i64, tpu.core_type = #tpu.core_type<tc>} {
    %c0 = arith.constant 0 : index
    %c0_0 = arith.constant 0 : index
    %0 = vector.load %arg0[%c0, %c0_0] : memref<128x128xbf16, #tpu.memory_space<vmem>>, vector<128x128xbf16>
    %c0_1 = arith.constant 0 : index
    %c0_2 = arith.constant 0 : index
    %1 = vector.load %arg1[%c0_1, %c0_2] : memref<128x128xbf16, #tpu.memory_space<vmem>>, vector<128x128xbf16>
    %cst = arith.constant dense<0.000000e+00> : vector<128x128xf32>
    %2 = tpu.matmul %0, %1, %cst {dimension_numbers = #tpu.dot_dimension_numbers<[1], [0], [0], [1], [0, 0, 1, 1], [], []>} : vector<128x128xbf16>, vector<128x128xbf16>, vector<128x128xf32> -> vector<128x128xf32>
    %c0_3 = arith.constant 0 : index
    %c0_4 = arith.constant 0 : index
    %3 = vector.load %arg2[%c0_3, %c0_4] : memref<128x128xbf16, #tpu.memory_space<vmem>>, vector<128x128xbf16>
    %4 = arith.extf %3 : vector<128x128xbf16> to vector<128x128xf32>
    %cst_5 = arith.constant dense<0.000000e+00> : vector<128x128xf32>
    %5 = tpu.matmul %2, %4, %cst_5 {dimension_numbers = #tpu.dot_dimension_numbers<[1], [0], [0], [1], [0, 0, 1, 1], [], []>} : vector<128x128xf32>, vector<128x128xf32>, vector<128x128xf32> -> vector<128x128xf32>
    %c0_6 = arith.constant 0 : index
    %c0_7 = arith.constant 0 : index
    %6 = vector.load %arg3[%c0_6, %c0_7] : memref<1x128xf32, #tpu.memory_space<vmem>>, vector<1x128xf32>
    %7 = vector.broadcast %6 : vector<1x128xf32> to vector<128x128xf32>
    %8 = arith.addf %5, %7 : vector<128x128xf32>
    %cst_8 = arith.constant 0.000000e+00 : f32
    %9 = vector.broadcast %cst_8 : f32 to vector<128x128xf32>
    %10 = arith.maximumf %8, %9 : vector<128x128xf32>
    %11 = arith.truncf %10 : vector<128x128xf32> to vector<128x128xbf16>
    %cst_9 = arith.constant dense<0.000000e+00> : vector<128x128xf32>
    %12 = tpu.matmul %0, %11, %cst_9 {dimension_numbers = #tpu.dot_dimension_numbers<[1], [0], [0], [1], [0, 0, 1, 1], [], []>} : vector<128x128xbf16>, vector<128x128xbf16>, vector<128x128xf32> -> vector<128x128xf32>
    %c0_10 = arith.constant 0 : index
    %c0_11 = arith.constant 0 : index
    %13 = vector.load %arg4[%c0_10, %c0_11] : memref<128x128xbf16, #tpu.memory_space<vmem>>, vector<128x128xbf16>
    %14 = arith.extf %13 : vector<128x128xbf16> to vector<128x128xf32>
    %cst_12 = arith.constant dense<0.000000e+00> : vector<128x128xf32>
    %15 = tpu.matmul %12, %14, %cst_12 {dimension_numbers = #tpu.dot_dimension_numbers<[1], [0], [0], [1], [0, 0, 1, 1], [], []>} : vector<128x128xf32>, vector<128x128xf32>, vector<128x128xf32> -> vector<128x128xf32>
    %c0_13 = arith.constant 0 : index
    %c0_14 = arith.constant 0 : index
    %16 = vector.load %arg5[%c0_13, %c0_14] : memref<1x128xf32, #tpu.memory_space<vmem>>, vector<1x128xf32>
    %17 = vector.broadcast %16 : vector<1x128xf32> to vector<128x128xf32>
    %18 = arith.addf %15, %17 : vector<128x128xf32>
    %c0_15 = arith.constant 0 : index
    %c0_16 = arith.constant 0 : index
    %19 = vector.load %arg6[%c0_15, %c0_16] : memref<128x128xf32, #tpu.memory_space<vmem>>, vector<128x128xf32>
    tpu.vector_store %arg6[%c0_15, %c0_16], %18 {strides = array<i32>} : memref<128x128xf32, #tpu.memory_space<vmem>>, vector<128x128xf32>,
    return
  }
}

</mosaic_0001>

<bundles_post_ra>
// kernel: tpu_custom_call.1
= control target key start
LH: loop header
LB: loop body
LE: loop exit
PB: predicated region body
PF: predicated region fallthrough
CT: control target
= control target key end

     0   :  { %11 = vsyncpa [#allocation3], 0  ;;  %s1679_s0 = inlined_call_operand.hbm [shape: bf16[128,128], index: 0, kind: input, shape index: {}]   ;;  %s1680_s1 = inlined_call_operand.hbm [shape: bf16[128,128], index: 1, kind: input, shape index: {}]   ;;  %s1681_s2 = inlined_call_operand.hbm [shape: bf16[128,128], index: 2, kind: input, shape index: {}]   ;;  %s1682_s3 = inlined_call_operand.hbm [shape: f32[1,128], index: 3, kind: input, shape index: {}]   ;;  %s1683_s4 = inlined_call_operand.hbm [shape: bf16[128,128], index: 4, kind: input, shape index: {}]   ;;  %s1684_s5 = inlined_call_operand.hbm [shape: f32[1,128], index: 5, kind: input, shape index: {}]   ;;  %s1685_s6 = inlined_call_operand.hbm [shape: f32[128,128], index: 6, kind: output, shape index: {}]  }
   0x1   :  { %12 = vsyncpa [#allocation6], 0 }
   0x2   :  { %13 = vsyncpa [#allocation9], 0 }
   0x3   :  { %14 = vsyncpa [#allocation12], 0 }
   0x4   :  { %15 = vsyncpa [#allocation4], 0  ;;  %s1476_s21 = smov [#allocation5]   ;;  %s1477_s23 = smov [#allocation8]  }
   0x5   :  { %s33_s22 = sshll.u32 %s1476_s21, 4  ;;  %s58_s24 = sshll.u32 %s1477_s23, 4  ;;  %s34_s22 = int_to_ptr.vmem [resolvable:$true] %s33_s22  ;;  %s1522_s24 = int_to_ptr.vmem [resolvable:$true] %s58_s24 }
   0x6   :  { %s1312_s27 = scalar_lea.hbm %s1680_s1, 1024 }
   0x7   :  { %p1313_p0 = scmp.ne.s32.totalorder %s1680_s1, %s1312_s27  ;;  %p1316_p1 = scmp.lt.u32.totalorder %s1312_s27, %s1680_s1 }
   0x9   :  { %p1318_p2 = pnand %p1316_p1, %p1313_p0 }
   0xb   :  { %1321 = shalt.err (!%p1318_p2)
}
   0xc   :  { %s1322_s8 = scalar_lea.vmem %s34_s22, 1024  ;;  %p1327_p4 = scmp.lt.s32.totalorder %s34_s22, %s34_s22 }
   0xd   :  { %p1323_p3 = scmp.ne.s32.totalorder %s34_s22, %s1322_s8  ;;  %p1328_p5 = scmp.lt.s32.totalorder %s1322_s8, %s1322_s8 }
   0xf   :  { %p1329_p6 = por %p1328_p5, %p1327_p4 }
  0x11   :  { %p1330_p7 = pnand %p1329_p6, %p1323_p3 }
  0x13   :  { %1333 = shalt.err (!%p1330_p7)
}
  0x14   :  { %s1478_s9 = smov 64   ;;  %s1479_s10 = smov 4  }
  0x15   :  { %39 = dma.hbm_to_vmem [thread:$0]  %s1680_s1, 1024, %s34_s22, [#allocation6], %s1478_s9, %s1478_s9, %s1479_s10  }
  0x16   :  { %s1334_s15 = scalar_lea.hbm %s1682_s3, 16 }
  0x17   :  { %p1335_p8 = scmp.ne.s32.totalorder %s1682_s3, %s1334_s15  ;;  %p1338_p9 = scmp.lt.u32.totalorder %s1334_s15, %s1682_s3 }
  0x19   :  { %p1340_p10 = pnand %p1338_p9, %p1335_p8 }
  0x1b   :  { %1343 = shalt.err (!%p1340_p10)
}
  0x1c   :  { %s1344_s20 = scalar_lea.vmem %s1522_s24, 16  ;;  %s1348_s1 = scalar_lea.vmem %s1522_s24, 32 }
  0x1d   :  { %p1345_p11 = scmp.ne.s32.totalorder %s1522_s24, %s1344_s20  ;;  %p1349_p12 = scmp.lt.s32.totalorder %s1522_s24, %s1522_s24 }
  0x1e   :  { %p1350_p13 = scmp.lt.s32.totalorder %s1348_s1, %s1344_s20 }
  0x20   :  { %p1351_p0 = por %p1350_p13, %p1349_p12 }
  0x22   :  { %p1352_p1 = pnand %p1351_p0, %p1345_p11 }
  0x24   :  { %1355 = shalt.err (!%p1352_p1)
}
  0x25   :  { %61 = dma.hbm_to_vmem [thread:$0]  %s1682_s3, 16, %s1522_s24, [#allocation9]  }
  0x26   :  { %s1480_s23 = smov [#allocation2]   ;;  %s1481_s26 = smov [#allocation7]  }
  0x27   :  { %s21_s25 = sshll.u32 %s1480_s23, 4  ;;  %s45_s27 = sshll.u32 %s1481_s26, 4  ;;  %s22_s25 = int_to_ptr.vmem [resolvable:$true] %s21_s25  ;;  %s1557_s27 = int_to_ptr.vmem [resolvable:$true] %s45_s27 }
  0x28   :  { %s1356_s30 = scalar_lea.hbm %s1679_s0, 1024 }
  0x29   :  { %p1357_p2 = scmp.ne.s32.totalorder %s1679_s0, %s1356_s30  ;;  %p1360_p3 = scmp.lt.u32.totalorder %s1356_s30, %s1679_s0 }
  0x2b   :  { %p1362_p4 = pnand %p1360_p3, %p1357_p2 }
  0x2d   :  { %1365 = shalt.err (!%p1362_p4)
}
  0x2e   :  { %s1366_s3 = scalar_lea.vmem %s22_s25, 1024  ;;  %p1371_p6 = scmp.lt.s32.totalorder %s22_s25, %s22_s25 }
  0x2f   :  { %p1367_p5 = scmp.ne.s32.totalorder %s22_s25, %s1366_s3  ;;  %p1372_p7 = scmp.lt.s32.totalorder %s1366_s3, %s1366_s3 }
  0x31   :  { %p1373_p8 = por %p1372_p7, %p1371_p6 }
  0x33   :  { %p1374_p9 = pnand %p1373_p8, %p1367_p5 }
  0x35   :  { %1377 = shalt.err (!%p1374_p9)
}
  0x36   :  { %27 = dma.hbm_to_vmem [thread:$0]  %s1679_s0, 1024, %s22_s25, [#allocation3], %s1478_s9, %s1478_s9, %s1479_s10  }
  0x37   :  { %s1378_s16 = scalar_lea.hbm %s1681_s2, 1024 }
  0x38   :  { %p1379_p10 = scmp.ne.s32.totalorder %s1681_s2, %s1378_s16  ;;  %p1382_p11 = scmp.lt.u32.totalorder %s1378_s16, %s1681_s2 }
  0x3a   :  { %p1384_p12 = pnand %p1382_p11, %p1379_p10 }
  0x3c   :  { %1387 = shalt.err (!%p1384_p12)
}
  0x3d   :  { %s1388_s1 = scalar_lea.vmem %s1557_s27, 1024  ;;  %p1393_p0 = scmp.lt.s32.totalorder %s1557_s27, %s1557_s27 }
  0x3e   :  { %p1389_p13 = scmp.ne.s32.totalorder %s1557_s27, %s1388_s1  ;;  %p1394_p1 = scmp.lt.s32.totalorder %s1388_s1, %s1388_s1 }
  0x40   :  { %p1395_p2 = por %p1394_p1, %p1393_p0 }
  0x42   :  { %p1396_p3 = pnand %p1395_p2, %p1389_p13 }
  0x44   :  { %1399 = shalt.err (!%p1396_p3)
}
  0x45   :  { %51 = dma.hbm_to_vmem [thread:$0]  %s1681_s2, 1024, %s1557_s27, [#allocation6], %s1478_s9, %s1478_s9, %s1479_s10  }
  0x46   :  { %s1482_s22 = smov [#allocation10]   ;;  %s1483_s25 = smov [#allocation11]  }
  0x47   :  { %s67_s23 = sshll.u32 %s1482_s22, 4  ;;  %s80_s26 = sshll.u32 %s1483_s25, 4  ;;  %s68_s23 = int_to_ptr.vmem [resolvable:$true] %s67_s23  ;;  %s81_s26 = int_to_ptr.vmem [resolvable:$true] %s80_s26 }
  0x48   :  { %s1400_s30 = scalar_lea.hbm %s1683_s4, 1024 }
  0x49   :  { %p1401_p4 = scmp.ne.s32.totalorder %s1683_s4, %s1400_s30  ;;  %p1404_p5 = scmp.lt.u32.totalorder %s1400_s30, %s1683_s4 }
  0x4b   :  { %p1406_p6 = pnand %p1404_p5, %p1401_p4 }
  0x4d   :  { %1409 = shalt.err (!%p1406_p6)
}
  0x4e   :  { %s1410_s2 = scalar_lea.vmem %s68_s23, 1024  ;;  %p1415_p8 = scmp.lt.s32.totalorder %s68_s23, %s68_s23 }
  0x4f   :  { %p1411_p7 = scmp.ne.s32.totalorder %s68_s23, %s1410_s2  ;;  %p1416_p9 = scmp.lt.s32.totalorder %s1410_s2, %s1410_s2 }
  0x51   :  { %p1417_p10 = por %p1416_p9, %p1415_p8 }
  0x53   :  { %p1418_p11 = pnand %p1417_p10, %p1411_p7 }
  0x55   :  { %1421 = shalt.err (!%p1418_p11)
}
  0x56   :  { %73 = dma.hbm_to_vmem [thread:$0]  %s1683_s4, 1024, %s68_s23, [#allocation9], %s1478_s9, %s1478_s9, %s1479_s10  }
  0x57   :  { %s1422_s14 = scalar_lea.hbm %s1684_s5, 16 }
  0x58   :  { %p1423_p12 = scmp.ne.s32.totalorder %s1684_s5, %s1422_s14  ;;  %p1426_p13 = scmp.lt.u32.totalorder %s1422_s14, %s1684_s5 }
  0x5a   :  { %p1428_p0 = pnand %p1426_p13, %p1423_p12 }
  0x5c   :  { %1431 = shalt.err (!%p1428_p0)
}
  0x5d   :  { %s1432_s19 = scalar_lea.vmem %s81_s26, 16  ;;  %s1436_s20 = scalar_lea.vmem %s81_s26, 32 }
  0x5e   :  { %p1433_p1 = scmp.ne.s32.totalorder %s81_s26, %s1432_s19  ;;  %p1437_p2 = scmp.lt.s32.totalorder %s81_s26, %s81_s26 }
  0x5f   :  { %p1438_p3 = scmp.lt.s32.totalorder %s1436_s20, %s1432_s19 }
  0x61   :  { %p1439_p4 = por %p1438_p3, %p1437_p2 }
  0x63   :  { %p1440_p5 = pnand %p1439_p4, %p1433_p1 }
  0x65   :  { %1443 = shalt.err (!%p1440_p5)
}
  0x66   :  { %83 = dma.hbm_to_vmem [thread:$0]  %s1684_s5, 16, %s81_s26, [#allocation12]  }
  0x67   :  { %1466 = dma.done.wait [#allocation3], 1024  }
  0x68   :  { %1467 = vsyncadd [#allocation3], 4294966272 }
  0x69   :  { %1468 = dma.done.wait [#allocation6], 2048  }
  0x6a   :  { %1469 = vsyncadd [#allocation6], 4294965248 }
  0x6b   :  { %1470 = dma.done.wait [#allocation9], 1040  }
  0x6c   :  { %1471 = vsyncadd [#allocation9], 4294966256 }
  0x6d   :  { %1472 = dma.done.wait [#allocation12], 16  }
  0x6e   :  { %1473 = vsyncadd [#allocation12], 4294967280  ;;  %v1296_v0 = vld [vmem:[#allocation5] sm:$0xff]   ;;  %v1297_v1 = vld [vmem:[#allocation5 + $0x8] sm:$0xff]   ;;  %s1484_s5 = smov [#allocation13]  }
  0x6f   :  { %1045 = vmatprep.subr.bf16.mxu0 %v1296_v0  ;;  %v1298_v2 = vld [vmem:[#allocation5 + $0x10] sm:$0xff]   ;;  %v1299_v3 = vld [vmem:[#allocation5 + $0x18] sm:$0xff]   ;;  %v1304_v4 = vld [vmem:[#allocation2] sm:$0xff]   ;;  %s838_s10 = sshll.u32 %s1484_s5, 4  ;;  %s839_s10 = int_to_ptr.vmem [resolvable:$true] %s838_s10 }
  0x70   :  { %1046 = vmatpush3.bf16.msra.mxu0 %v1296_v0  ;;  %1061 = vmatprep.mubr.bf16.mxu0 %v1304_v4  ;;  %v1300_v5 = vld [vmem:[#allocation5 + $0x20] sm:$0xff]   ;;  %v1301_v6 = vld [vmem:[#allocation5 + $0x28] sm:$0xff]   ;;  %v1302_v9 = vld [vmem:[#allocation5 + $0x30] sm:$0xff]   ;;  %s1444_s1 = scalar_lea.vmem %s839_s10, 2048  ;;  %p1449_p7 = scmp.lt.s32.totalorder %s839_s10, %s839_s10 }
  0x71   :  { %1047 = vmatprep.subr.bf16.mxu0 %v1297_v1  ;;  %v872_v7 = vld [vmem:[#allocation7] sm:$0xff]   ;;  %v935_v8 = vld [vmem:[#allocation7 + $0x8] sm:$0xff]   ;;  %v936_v10 = vld [vmem:[#allocation7 + $0x10] sm:$0xff]   ;;  %p1445_p6 = scmp.ne.s32.totalorder %s839_s10, %s1444_s1  ;;  %p1450_p8 = scmp.lt.s32.totalorder %s1444_s1, %s1444_s1 }
  0x72   :  { %1222 = vmatprep.subr.bf16.mxu1 %v872_v7  ;;  %v1303_v11 = vld [vmem:[#allocation5 + $0x38] sm:$0xff]   ;;  %v938_v13 = vld [vmem:[#allocation7 + $0x20] sm:$0xff]   ;;  %v1621_v14 = vld [vmem:[#allocation2 + $0x8] sm:$0xff]  }
  0x73   :  { %1224 = vmatpush3.bf16.msra.mxu1 %v872_v7  ;;  %v937_v12 = vld [vmem:[#allocation7 + $0x18] sm:$0xff]   ;;  %v1623_v15 = vld [vmem:[#allocation2 + $0x10] sm:$0xff]   ;;  %v939_v16 = vld [vmem:[#allocation7 + $0x28] sm:$0xff]   ;;  %p1451_p9 = por %p1450_p8, %p1449_p7 }
  0x74   :  { %1048 = vmatpush3.bf16.msra.mxu0 %v1297_v1  ;;  %1226 = vmatprep.subr.bf16.mxu1 %v935_v8  ;;  %v940_v17 = vld [vmem:[#allocation7 + $0x30] sm:$0xff]   ;;  %v1627_v18 = vld [vmem:[#allocation2 + $0x18] sm:$0xff]   ;;  %v1629_v19 = vld [vmem:[#allocation2 + $0x20] sm:$0xff]  }
  0x75   :  { %1049 = vmatprep.subr.bf16.mxu0 %v1298_v2  ;;  %v1633_v20 = vld [vmem:[#allocation2 + $0x28] sm:$0xff]   ;;  %v1635_v21 = vld [vmem:[#allocation2 + $0x30] sm:$0xff]   ;;  %v1639_v22 = vld [vmem:[#allocation2 + $0x38] sm:$0xff]   ;;  %p1452_p10 = pnand %p1451_p9, %p1445_p6 }
  0x76   :  { %v941_v23 = vld [vmem:[#allocation7 + $0x38] sm:$0xff]   ;;  %v904_v40 = vld [vmem:[#allocation10] sm:$0xff]   ;;  %v942_v41 = vld [vmem:[#allocation10 + $0x8] sm:$0xff]  }
  0x77   :  { %1228 = vmatpush3.bf16.msra.mxu1 %v935_v8  ;;  %v943_v42 = vld [vmem:[#allocation10 + $0x10] sm:$0xff]   ;;  %v944_v43 = vld [vmem:[#allocation10 + $0x18] sm:$0xff]   ;;  %v945_v44 = vld [vmem:[#allocation10 + $0x20] sm:$0xff]  }
  0x78   :  { %1050 = vmatpush3.bf16.msra.mxu0 %v1298_v2  ;;  %1230 = vmatprep.subr.bf16.mxu1 %v936_v10  ;;  %v946_v45 = vld [vmem:[#allocation10 + $0x28] sm:$0xff]   ;;  %v947_v46 = vld [vmem:[#allocation10 + $0x30] sm:$0xff]   ;;  %v1642_v47 = vld [vmem:[#allocation8] ss:$0 sm:$0xff] }
  0x79   :  { %1051 = vmatprep.subr.bf16.mxu0 %v1299_v3 }
  0x7b   :  { %1232 = vmatpush3.bf16.msra.mxu1 %v936_v10 }
  0x7c   :  { %1052 = vmatpush3.bf16.msra.mxu0 %v1299_v3  ;;  %1234 = vmatprep.subr.bf16.mxu1 %v937_v12 }
  0x7d   :  { %1053 = vmatprep.subr.bf16.mxu0 %v1300_v5 }
  0x7f   :  { %1236 = vmatpush3.bf16.msra.mxu1 %v937_v12 }
  0x80   :  { %1054 = vmatpush3.bf16.msra.mxu0 %v1300_v5  ;;  %1238 = vmatprep.subr.bf16.mxu1 %v938_v13 }
  0x81   :  { %1055 = vmatprep.subr.bf16.mxu0 %v1301_v6 }
  0x83   :  { %1240 = vmatpush3.bf16.msra.mxu1 %v938_v13 }
  0x84   :  { %1056 = vmatpush3.bf16.msra.mxu0 %v1301_v6  ;;  %1242 = vmatprep.subr.bf16.mxu1 %v939_v16 }
  0x85   :  { %1057 = vmatprep.subr.bf16.mxu0 %v1302_v9 }
  0x87   :  { %1244 = vmatpush3.bf16.msra.mxu1 %v939_v16 }
  0x88   :  { %1058 = vmatpush3.bf16.msra.mxu0 %v1302_v9  ;;  %1246 = vmatprep.subr.bf16.mxu1 %v940_v17 }
  0x89   :  { %1059 = vmatprep.subr.bf16.mxu0 %v1303_v11 }
  0x8b   :  { %1248 = vmatpush3.bf16.msra.mxu1 %v940_v17 }
  0x8c   :  { %1060 = vmatpush3.bf16.msra.mxu0 %v1303_v11  ;;  %1250 = vmatprep.subr.bf16.mxu1 %v941_v23 }
  0x8f   :  { %1062 = vmatmul.mubr.bf16.vlgmr.msra.gmra.mrb[0].mxu0 %v1621_v14  ;;  %1252 = vmatpush3.bf16.msra.mxu1 %v941_v23 }
  0x90   :  { %1065 = vmatprep.mubr.bf16.mxu0 %v1623_v15  ;;  %1254 = vmatprep.subr.bf16.mxu1 %v904_v40 }
  0x97   :  { %1066 = vmatmul.mubr.bf16.gmra.mrb[4].mxu0 %v1627_v18 }
  0x98   :  { %1069 = vmatprep.mubr.bf16.mxu0 %v1629_v19 }
  0x9f   :  { %1070 = vmatmul.mubr.bf16.gmra.mrb[8].mxu0 %v1633_v20 }
  0xa0   :  { %1073 = vmatprep.mubr.bf16.mxu0 %v1635_v21 }
  0xa7   :  { %1074 = vmatmul.mubr.bf16.gmra.mrb[12].mxu0 %v1639_v22 }
  0xa8   :  { %1149 = vmatprep.mubr.bf16.mxu0 %v1304_v4 }
 0x162   :  { %v1063_v24 = vpop.f32.mrb[0].mxu0 }
 0x163   :  { %v265_v25 = vpop.f32.mrb[1].mxu0 }
 0x164   :  { %v1064_v26 = vpop.f32.mrb[2].mxu0  ;;  %1109 = vmatprep.mubr.f32.mxu1 %v265_v25 }
 0x165   :  { %v268_v27 = vpop.f32.mrb[3].mxu0 }
 0x166   :  { %1110 = vmatmul.mubr.f32.vlgmr.msra.gmra.mrb[0].mxu1 %v268_v27 }
 0x167   :  { %1112 = vmatprep.mubr.f32.mxu1 %v1063_v24  ;;  %1256 = vmatpush3.bf16.msra.mxu1 %v904_v40 }
 0x168   :  { %1258 = vmatprep.subr.bf16.mxu1 %v942_v41 }
 0x16a   :  { %v1067_v28 = vpop.f32.mrb[4].mxu0  ;;  %1113 = vmatmul.mubr.f32.gmra.mrb[2].mxu1 %v1064_v26 }
 0x16b   :  { %v281_v29 = vpop.f32.mrb[5].mxu0  ;;  %1260 = vmatpush3.bf16.msra.mxu1 %v942_v41 }
 0x16c   :  { %v1068_v30 = vpop.f32.mrb[6].mxu0  ;;  %1115 = vmatprep.mubr.f32.mxu1 %v281_v29  ;;  %1262 = vmatprep.subr.bf16.mxu1 %v943_v42 }
 0x16d   :  { %v284_v31 = vpop.f32.mrb[7].mxu0 }
 0x16e   :  { %1116 = vmatmul.mubr.f32.gmra.mrb[4].mxu1 %v284_v31 }
 0x16f   :  { %1118 = vmatprep.mubr.f32.mxu1 %v1067_v28  ;;  %1264 = vmatpush3.bf16.msra.mxu1 %v943_v42 }
 0x170   :  { %1266 = vmatprep.subr.bf16.mxu1 %v944_v43 }
 0x172   :  { %v1071_v32 = vpop.f32.mrb[8].mxu0  ;;  %1119 = vmatmul.mubr.f32.gmra.mrb[6].mxu1 %v1068_v30 }
 0x173   :  { %v297_v33 = vpop.f32.mrb[9].mxu0  ;;  %1268 = vmatpush3.bf16.msra.mxu1 %v944_v43 }
 0x174   :  { %v1072_v34 = vpop.f32.mrb[10].mxu0  ;;  %1121 = vmatprep.mubr.f32.mxu1 %v297_v33  ;;  %1270 = vmatprep.subr.bf16.mxu1 %v945_v44 }
 0x175   :  { %v300_v35 = vpop.f32.mrb[11].mxu0 }
 0x176   :  { %1122 = vmatmul.mubr.f32.gmra.mrb[8].mxu1 %v300_v35 }
 0x177   :  { %1124 = vmatprep.mubr.f32.mxu1 %v1071_v32  ;;  %1272 = vmatpush3.bf16.msra.mxu1 %v945_v44 }
 0x178   :  { %1274 = vmatprep.subr.bf16.mxu1 %v946_v45 }
 0x17a   :  { %v1075_v36 = vpop.f32.mrb[12].mxu0  ;;  %1125 = vmatmul.mubr.f32.gmra.mrb[10].mxu1 %v1072_v34 }
 0x17b   :  { %v313_v37 = vpop.f32.mrb[13].mxu0  ;;  %1276 = vmatpush3.bf16.msra.mxu1 %v946_v45 }
 0x17c   :  { %v1076_v38 = vpop.f32.mrb[14].mxu0  ;;  %1127 = vmatprep.mubr.f32.mxu1 %v313_v37  ;;  %1278 = vmatprep.subr.bf16.mxu1 %v947_v46 }
 0x17d   :  { %v316_v39 = vpop.f32.mrb[15].mxu0 }
 0x17e   :  { %1128 = vmatmul.mubr.f32.gmra.mrb[12].mxu1 %v316_v39 }
 0x17f   :  { %1130 = vmatprep.mubr.f32.mxu1 %v1075_v36  ;;  %1280 = vmatpush3.bf16.msra.mxu1 %v947_v46 }
 0x182   :  { %1131 = vmatmul.mubr.f32.gmra.mrb[14].mxu1 %v1076_v38 }
 0x239   :  { %v1111_v48 = vpop.f32.mrb[0].mxu1 }
 0x23a   :  { %v439_v49 = vadd.f32 %v1111_v48, %v1642_v47  ;;  %v433_v50 = vpop.f32.mrb[1].mxu1 }
 0x23b   :  { %v434_v51 = vadd.f32 %v1642_v47, %v433_v50 }
 0x23c   :  { %v513_v52 = vmax.f32 %v439_v49, 0.0 }
 0x23d   :  { %v512_v53 = vmax.f32 %v434_v51, 0.0  ;;  %v1114_v54 = vpop.f32.mrb[2].mxu1 }
 0x23e   :  { %v449_v55 = vadd.f32 %v1114_v54, %v1642_v47  ;;  %v443_v56 = vpop.f32.mrb[3].mxu1 }
 0x23f   :  { %v528_v57 = vpack.c.bf16 %v513_v52, %v512_v53  ;;  %v444_v58 = vadd.f32 %v1642_v47, %v443_v56 }
 0x240   :  { %v515_v59 = vmax.f32 %v449_v55, 0.0 }
 0x241   :  { %v514_v60 = vmax.f32 %v444_v58, 0.0  ;;  %v1117_v61 = vpop.f32.mrb[4].mxu1  ;;  %1133 = vmatprep.subr.bf16.mxu0 %v528_v57 }
 0x242   :  { %v459_v62 = vadd.f32 %v1117_v61, %v1642_v47  ;;  %v453_v63 = vpop.f32.mrb[5].mxu1  ;;  %1134 = vmatpush3.bf16.msra.mxu0 %v528_v57  ;;  %v870_v57 = vld [vmem:[#allocation11] ss:$0 sm:$0xff] }
 0x243   :  { %v529_v0 = vpack.c.bf16 %v515_v59, %v514_v60  ;;  %v454_v1 = vadd.f32 %v1642_v47, %v453_v63 }
 0x244   :  { %v517_v2 = vmax.f32 %v459_v62, 0.0 }
 0x245   :  { %v516_v3 = vmax.f32 %v454_v1, 0.0  ;;  %v1120_v4 = vpop.f32.mrb[6].mxu1  ;;  %1135 = vmatprep.subr.bf16.mxu0 %v529_v0 }
 0x246   :  { %v469_v5 = vadd.f32 %v1120_v4, %v1642_v47  ;;  %v463_v6 = vpop.f32.mrb[7].mxu1  ;;  %1136 = vmatpush3.bf16.msra.mxu0 %v529_v0 }
 0x247   :  { %v530_v7 = vpack.c.bf16 %v517_v2, %v516_v3  ;;  %v464_v8 = vadd.f32 %v1642_v47, %v463_v6 }
 0x248   :  { %v519_v9 = vmax.f32 %v469_v5, 0.0 }
 0x249   :  { %v518_v10 = vmax.f32 %v464_v8, 0.0  ;;  %v1123_v11 = vpop.f32.mrb[8].mxu1  ;;  %1137 = vmatprep.subr.bf16.mxu0 %v530_v7 }
 0x24a   :  { %v479_v12 = vadd.f32 %v1123_v11, %v1642_v47  ;;  %v473_v13 = vpop.f32.mrb[9].mxu1  ;;  %1138 = vmatpush3.bf16.msra.mxu0 %v530_v7 }
 0x24b   :  { %v531_v16 = vpack.c.bf16 %v519_v9, %v518_v10  ;;  %v474_v17 = vadd.f32 %v1642_v47, %v473_v13 }
 0x24c   :  { %v521_v23 = vmax.f32 %v479_v12, 0.0 }
 0x24d   :  { %v520_v24 = vmax.f32 %v474_v17, 0.0  ;;  %v1126_v25 = vpop.f32.mrb[10].mxu1  ;;  %1139 = vmatprep.subr.bf16.mxu0 %v531_v16 }
 0x24e   :  { %v489_v26 = vadd.f32 %v1126_v25, %v1642_v47  ;;  %v483_v27 = vpop.f32.mrb[11].mxu1  ;;  %1140 = vmatpush3.bf16.msra.mxu0 %v531_v16 }
 0x24f   :  { %v532_v28 = vpack.c.bf16 %v521_v23, %v520_v24  ;;  %v484_v29 = vadd.f32 %v1642_v47, %v483_v27 }
 0x250   :  { %v523_v30 = vmax.f32 %v489_v26, 0.0 }
 0x251   :  { %v522_v31 = vmax.f32 %v484_v29, 0.0  ;;  %v1129_v32 = vpop.f32.mrb[12].mxu1  ;;  %1141 = vmatprep.subr.bf16.mxu0 %v532_v28 }
 0x252   :  { %v499_v33 = vadd.f32 %v1129_v32, %v1642_v47  ;;  %v493_v34 = vpop.f32.mrb[13].mxu1  ;;  %1142 = vmatpush3.bf16.msra.mxu0 %v532_v28 }
 0x253   :  { %v533_v35 = vpack.c.bf16 %v523_v30, %v522_v31  ;;  %v494_v36 = vadd.f32 %v1642_v47, %v493_v34 }
 0x254   :  { %v525_v37 = vmax.f32 %v499_v33, 0.0 }
 0x255   :  { %v524_v38 = vmax.f32 %v494_v36, 0.0  ;;  %v1132_v39 = vpop.f32.mrb[14].mxu1  ;;  %1143 = vmatprep.subr.bf16.mxu0 %v533_v35 }
 0x256   :  { %v509_v40 = vadd.f32 %v1132_v39, %v1642_v47  ;;  %v503_v41 = vpop.f32.mrb[15].mxu1  ;;  %1144 = vmatpush3.bf16.msra.mxu0 %v533_v35 }
 0x257   :  { %v534_v42 = vpack.c.bf16 %v525_v37, %v524_v38  ;;  %v504_v43 = vadd.f32 %v1642_v47, %v503_v41  ;;  %v948_v47 = vld [vmem:[#allocation10 + $0x38] sm:$0xff]  }
 0x258   :  { %v527_v44 = vmax.f32 %v509_v40, 0.0  ;;  %1282 = vmatprep.subr.bf16.mxu1 %v948_v47 }
 0x259   :  { %v526_v45 = vmax.f32 %v504_v43, 0.0  ;;  %1145 = vmatprep.subr.bf16.mxu0 %v534_v42  ;;  %1284 = vmatpush3.bf16.msra.mxu1 %v948_v47 }
 0x25a   :  { %1146 = vmatpush3.bf16.msra.mxu0 %v534_v42 }
 0x25b   :  { %v535_v46 = vpack.c.bf16 %v527_v44, %v526_v45 }
 0x25d   :  { %1147 = vmatprep.subr.bf16.mxu0 %v535_v46 }
 0x25e   :  { %1148 = vmatpush3.bf16.msra.mxu0 %v535_v46 }
 0x261   :  { %1150 = vmatmul.mubr.bf16.vlgmr.msra.gmra.mrb[16].mxu0 %v1621_v14 }
 0x262   :  { %1153 = vmatprep.mubr.bf16.mxu0 %v1623_v15 }
 0x269   :  { %1154 = vmatmul.mubr.bf16.gmra.mrb[20].mxu0 %v1627_v18 }
 0x26a   :  { %1157 = vmatprep.mubr.bf16.mxu0 %v1629_v19 }
 0x271   :  { %1158 = vmatmul.mubr.bf16.gmra.mrb[24].mxu0 %v1633_v20 }
 0x272   :  { %1161 = vmatprep.mubr.bf16.mxu0 %v1635_v21 }
 0x279   :  { %1162 = vmatmul.mubr.bf16.gmra.mrb[28].mxu0 %v1639_v22 }
 0x334   :  { %v1151_v48 = vpop.f32.mrb[16].mxu0 }
 0x335   :  { %v570_v49 = vpop.f32.mrb[17].mxu0 }
 0x336   :  { %v1152_v50 = vpop.f32.mrb[18].mxu0  ;;  %1197 = vmatprep.mubr.f32.mxu1 %v570_v49 }
 0x337   :  { %v573_v14 = vpop.f32.mrb[19].mxu0 }
 0x338   :  { %1198 = vmatmul.mubr.f32.vlgmr.msra.gmra.mrb[16].mxu1 %v573_v14 }
 0x339   :  { %1200 = vmatprep.mubr.f32.mxu1 %v1151_v48 }
 0x33c   :  { %v1155_v15 = vpop.f32.mrb[20].mxu0  ;;  %1201 = vmatmul.mubr.f32.gmra.mrb[18].mxu1 %v1152_v50 }
 0x33d   :  { %v586_v18 = vpop.f32.mrb[21].mxu0 }
 0x33e   :  { %v1156_v19 = vpop.f32.mrb[22].mxu0  ;;  %1203 = vmatprep.mubr.f32.mxu1 %v586_v18 }
 0x33f   :  { %v589_v20 = vpop.f32.mrb[23].mxu0 }
 0x340   :  { %1204 = vmatmul.mubr.f32.gmra.mrb[20].mxu1 %v589_v20 }
 0x341   :  { %1206 = vmatprep.mubr.f32.mxu1 %v1155_v15 }
 0x344   :  { %v1159_v21 = vpop.f32.mrb[24].mxu0  ;;  %1207 = vmatmul.mubr.f32.gmra.mrb[22].mxu1 %v1156_v19 }
 0x345   :  { %v602_v22 = vpop.f32.mrb[25].mxu0 }
 0x346   :  { %v1160_v51 = vpop.f32.mrb[26].mxu0  ;;  %1209 = vmatprep.mubr.f32.mxu1 %v602_v22 }
 0x347   :  { %v605_v52 = vpop.f32.mrb[27].mxu0 }
 0x348   :  { %1210 = vmatmul.mubr.f32.gmra.mrb[24].mxu1 %v605_v52 }
 0x349   :  { %1212 = vmatprep.mubr.f32.mxu1 %v1159_v21 }
 0x34c   :  { %v1163_v53 = vpop.f32.mrb[28].mxu0  ;;  %1213 = vmatmul.mubr.f32.gmra.mrb[26].mxu1 %v1160_v51 }
 0x34d   :  { %v618_v54 = vpop.f32.mrb[29].mxu0 }
 0x34e   :  { %v1164_v55 = vpop.f32.mrb[30].mxu0  ;;  %1215 = vmatprep.mubr.f32.mxu1 %v618_v54 }
 0x34f   :  { %v621_v56 = vpop.f32.mrb[31].mxu0 }
 0x350   :  { %1216 = vmatmul.mubr.f32.gmra.mrb[28].mxu1 %v621_v56 }
 0x351   :  { %1218 = vmatprep.mubr.f32.mxu1 %v1163_v53 }
 0x354   :  { %1219 = vmatmul.mubr.f32.gmra.mrb[30].mxu1 %v1164_v55 }
 0x40b   :  { %v1199_v58 = vpop.f32.mrb[16].mxu1 }
 0x40c   :  { %v744_v59 = vadd.f32 %v1199_v58, %v870_v57  ;;  %v738_v60 = vpop.f32.mrb[17].mxu1 }
 0x40d   :  { %v739_v61 = vadd.f32 %v870_v57, %v738_v60 }
 0x40e   :  { %818 = vst [vmem:[#allocation13 + $0x8] sm:$0xff] %v744_v59 }
 0x40f   :  { %817 = vst [vmem:[#allocation13] sm:$0xff] %v739_v61  ;;  %v1202_v62 = vpop.f32.mrb[18].mxu1 }
 0x410   :  { %v754_v63 = vadd.f32 %v1202_v62, %v870_v57  ;;  %v748_v0 = vpop.f32.mrb[19].mxu1 }
 0x411   :  { %v749_v1 = vadd.f32 %v870_v57, %v748_v0 }
 0x412   :  { %820 = vst [vmem:[#allocation13 + $0x18] sm:$0xff] %v754_v63 }
 0x413   :  { %819 = vst [vmem:[#allocation13 + $0x10] sm:$0xff] %v749_v1  ;;  %v1205_v2 = vpop.f32.mrb[20].mxu1 }
 0x414   :  { %v764_v3 = vadd.f32 %v1205_v2, %v870_v57  ;;  %v758_v4 = vpop.f32.mrb[21].mxu1 }
 0x415   :  { %v759_v5 = vadd.f32 %v870_v57, %v758_v4 }
 0x416   :  { %822 = vst [vmem:[#allocation13 + $0x28] sm:$0xff] %v764_v3 }
 0x417   :  { %821 = vst [vmem:[#allocation13 + $0x20] sm:$0xff] %v759_v5  ;;  %v1208_v6 = vpop.f32.mrb[22].mxu1 }
 0x418   :  { %v774_v7 = vadd.f32 %v1208_v6, %v870_v57  ;;  %v768_v8 = vpop.f32.mrb[23].mxu1 }
 0x419   :  { %v769_v9 = vadd.f32 %v870_v57, %v768_v8 }
 0x41a   :  { %824 = vst [vmem:[#allocation13 + $0x38] sm:$0xff] %v774_v7 }
 0x41b   :  { %823 = vst [vmem:[#allocation13 + $0x30] sm:$0xff] %v769_v9  ;;  %v1211_v10 = vpop.f32.mrb[24].mxu1 }
 0x41c   :  { %v784_v11 = vadd.f32 %v1211_v10, %v870_v57  ;;  %v778_v12 = vpop.f32.mrb[25].mxu1 }
 0x41d   :  { %v779_v13 = vadd.f32 %v870_v57, %v778_v12 }
 0x41e   :  { %826 = vst [vmem:[#allocation13 + $0x48] sm:$0xff] %v784_v11 }
 0x41f   :  { %825 = vst [vmem:[#allocation13 + $0x40] sm:$0xff] %v779_v13  ;;  %v1214_v16 = vpop.f32.mrb[26].mxu1 }
 0x420   :  { %v794_v17 = vadd.f32 %v1214_v16, %v870_v57  ;;  %v788_v23 = vpop.f32.mrb[27].mxu1 }
 0x421   :  { %v789_v24 = vadd.f32 %v870_v57, %v788_v23 }
 0x422   :  { %828 = vst [vmem:[#allocation13 + $0x58] sm:$0xff] %v794_v17 }
 0x423   :  { %827 = vst [vmem:[#allocation13 + $0x50] sm:$0xff] %v789_v24  ;;  %v1217_v25 = vpop.f32.mrb[28].mxu1 }
 0x424   :  { %v804_v26 = vadd.f32 %v1217_v25, %v870_v57  ;;  %v798_v27 = vpop.f32.mrb[29].mxu1 }
 0x425   :  { %v799_v28 = vadd.f32 %v870_v57, %v798_v27 }
 0x426   :  { %830 = vst [vmem:[#allocation13 + $0x68] sm:$0xff] %v804_v26 }
 0x427   :  { %829 = vst [vmem:[#allocation13 + $0x60] sm:$0xff] %v799_v28  ;;  %v1220_v29 = vpop.f32.mrb[30].mxu1 }
 0x428   :  { %v814_v30 = vadd.f32 %v1220_v29, %v870_v57  ;;  %v808_v31 = vpop.f32.mrb[31].mxu1 }
 0x429   :  { %v809_v32 = vadd.f32 %v870_v57, %v808_v31 }
 0x42a   :  { %832 = vst [vmem:[#allocation13 + $0x78] sm:$0xff] %v814_v30 }
 0x42b   :  { %831 = vst [vmem:[#allocation13 + $0x70] sm:$0xff] %v809_v32 }
 0x42c   :  { %1455 = shalt.err (!%p1452_p10)
}
 0x42d   :  { %s1456_s22 = scalar_lea.hbm %s1685_s6, 2048 }
 0x42e   :  { %p1457_p11 = scmp.ne.s32.totalorder %s1685_s6, %s1456_s22  ;;  %p1460_p12 = scmp.lt.u32.totalorder %s1456_s22, %s1685_s6 }
 0x430   :  { %p1462_p13 = pnand %p1460_p12, %p1457_p11 }
 0x432   :  { %1465 = shalt.err (!%p1462_p13)
}
 0x433   :  { %s1485_s29 = smov 128   ;;  %s1486_s30 = smov 8  }
 0x434   :  { %844 = dma.vmem_to_hbm [thread:$0]  %s839_s10, 2048, %s1685_s6, [#allocation4], %s1485_s29, %s1485_s29, %s1486_s30  }
 0x435   :  { %1474 = dma.done.wait [#allocation4], 2048  }
 0x436   :  { %1475 = vsyncadd [#allocation4], 4294965248 }
 0x437   :  { %848 = vsyncpa [#allocation3], 1 }
 0x438   :  { %849 = vsyncpa [#allocation6], 1 }
 0x439   :  { %850 = vsyncpa [#allocation9], 1 }
 0x43a   :  { %851 = vsyncpa [#allocation12], 1 }
 0x43b   :  { %852 = vsyncpa [#allocation4], 1 }

</bundles_post_ra>
